<compile_context>
chip_gen: v6e
topology: v6e:2x2x1
jax: 0.10.0
libtpu: 0.0.40
codegen_flags: <defaults>
</compile_context>

<pallas_src>
import functools
import math

import jax
import jax.numpy as jnp
from jax import lax
from jax.experimental import pallas as pl
from jax.experimental.pallas import tpu as pltpu


def _down_kernel(band_ref, wg_ref, b_ref, alpha_ref, o_ref, *, TH, Wo, C4):
    """One grid step: one batch image x one band of TH output rows.

    band_ref : (TH+1, Wq, 4C) bf16   banded phase image (1-row halo)
    wg_ref   : (4, 4C, Cout) bf16    zero-padded shift-window weights
    b_ref    : (1, Cout) f32         bias
    alpha_ref: (1,) f32 in SMEM      PReLU slope (single shared parameter)
    o_ref    : (Cout, TH*Wo) f32     output block (NCHW slab, lane-dense)
    """
    M = TH * Wo
    y = None
    for dy in range(2):
        for dx in range(2):
            # Contiguous full-channel window: no per-tap lane extraction.
            win = band_ref[dy:dy + TH, dx:dx + Wo, :]          # (TH, Wo, 4C)
            win = win.reshape(M, C4)                           # (M, 4C)
            # MXU-natural (M,K)@(K,N): no hidden operand transpose.
            d = lax.dot_general(win, wg_ref[2 * dy + dx],
                                (((1,), (0,)), ((), ())),
                                preferred_element_type=jnp.float32)
            y = d if y is None else y + d                      # (M, Cout) f32

    y = y + b_ref[...]                                         # bias (1, Cout)
    alpha = alpha_ref[0]
    y = jnp.where(y >= 0.0, y, alpha * y)                      # PReLU (f32)
    # Single small transpose to the (Cout, M) NCHW-ordered output block.
    o_ref[...] = jnp.transpose(y).astype(o_ref.dtype)


def _pick_row_block(Ho, Wo, N, target_elems=4096):
    """Output rows per band.

    Guarantees (TH*Wo) % 128 == 0 (unmasked lane-dense stores) unless the whole
    image fits a single band; targets ~2k-8k elements per band; tries to give
    both v7x TensorCores work (N * RB >= 2)."""
    g = 128 // math.gcd(Wo, 128)          # smallest TH with (TH*Wo) % 128 == 0
    if g >= Ho:
        return Ho                          # tiny image: single band (full-dim block)
    th = max(1, target_elems // (g * Wo)) * g
    th = min(th, (Ho // g) * g)
    # v7x megacore: prefer at least 2 bands of total work.
    if N * ((Ho + th - 1) // th) < 2:
        th = max(g, (((Ho + 1) // 2) // g) * g)
    return th


def down_forward(x_nchw, weight, bias, alpha, *, target_band_elems=4096):
    """Equivalent of _down.forward.  x_nchw (N,C,H,W) f32 -> (N, 2C, H/2, W/2) f32."""
    N, C, H, W = x_nchw.shape
    Cout, Cin, KH, KW = weight.shape
    assert Cin == C and KH == 3 and KW == 3
    Ho = (H + 2 - 3) // 2 + 1
    Wo = (W + 2 - 3) // 2 + 1
    Hq, Wq = Ho + 1, Wo + 1
    C4 = 4 * C

    # ---- wrapper glue: NCHW -> NHWC, zero-pad, parity split + channel concat
    x = jnp.transpose(x_nchw, (0, 2, 3, 1))
    pad_b = 2 * Ho + 1 - H
    pad_r = 2 * Wo + 1 - W
    xp = jnp.pad(x, ((0, 0), (1, pad_b), (1, pad_r), (0, 0)))        # (N,2Hq,2Wq,C)
    # pcat[n,i,j,(2a+b)*C+c] = xp[n, 2i+a, 2j+b, c]
    pcat = xp.reshape(N, Hq, 2, Wq, 2, C).transpose(0, 1, 3, 2, 4, 5)
    pcat = pcat.reshape(N, Hq, Wq, C4).astype(jnp.bfloat16)

    TH = _pick_row_block(Ho, Wo, N, target_band_elems)
    RB = (Ho + TH - 1) // TH
    Ho_pad = RB * TH
    M = TH * Wo

    if Ho_pad > Ho:   # ragged last band: zero rows, the junk outputs are sliced off
        pcat = jnp.pad(pcat, ((0, 0), (0, Ho_pad - Ho), (0, 0), (0, 0)))
    # Overlapping (1-row halo) bands materialized once: (N, RB, TH+1, Wq, 4C)
    row_idx = jnp.arange(RB)[:, None] * TH + jnp.arange(TH + 1)[None, :]
    bands = pcat[:, row_idx]

    # ---- weights: regroup 9 taps into 4 shift windows with zero-padded slabs
    # tap (ky,kx): phase (a,b)=(ky%2,kx%2), shift (dy,dx)=(ky//2,kx//2)
    wt = weight.astype(jnp.float32)
    Wg = jnp.zeros((4, C4, Cout), jnp.float32)
    for dy in range(2):
        for dx in range(2):
            for a in range(2):
                for b in range(2):
                    ky, kx = 2 * dy + a, 2 * dx + b
                    if ky <= 2 and kx <= 2:
                        slab = 2 * a + b
                        Wg = Wg.at[2 * dy + dx, slab * C:(slab + 1) * C, :].set(
                            jnp.transpose(wt[:, :, ky, kx]))
    Wg = Wg.astype(jnp.bfloat16)
    b2 = bias.reshape(1, Cout).astype(jnp.float32)
    alpha1 = jnp.asarray(alpha, jnp.float32).reshape(1,)

    # ---- scoped VMEM budget from actual buffer sizes (x2 headroom, clamped)
    band_bytes = (TH + 1) * Wq * C4 * 2
    out_blk_bytes = Cout * M * 4
    wg_bytes = 4 * C4 * Cout * 2
    tmp_bytes = 2 * M * Cout * 4 + 2 * M * C4 * 2
    vmem_needed = 2 * band_bytes + 2 * out_blk_bytes + 2 * wg_bytes + tmp_bytes + 2 * Cout * 4
    vmem_limit = int(min(64 * 2 ** 20, max(32 * 2 ** 20, 2 * vmem_needed)))

    kernel = functools.partial(_down_kernel, TH=TH, Wo=Wo, C4=C4)

    out = pl.pallas_call(
        kernel,
        out_shape=jax.ShapeDtypeStruct((N, Cout, Ho_pad * Wo), jnp.float32),
        grid=(N, RB),
        in_specs=[
            # one banded phase block per grid step (auto double-buffered)
            pl.BlockSpec((None, None, TH + 1, Wq, C4), lambda n, r: (n, r, 0, 0, 0)),
            pl.BlockSpec((4, C4, Cout), lambda n, r: (0, 0, 0)),   # VMEM resident
            pl.BlockSpec((1, Cout), lambda n, r: (0, 0)),          # VMEM resident
            pl.BlockSpec(memory_space=pltpu.MemorySpace.SMEM),     # PReLU slope
        ],
        out_specs=pl.BlockSpec((None, Cout, M), lambda n, r: (n, 0, r)),
        compiler_params=pltpu.CompilerParams(
            dimension_semantics=("parallel", "parallel"),
            vmem_limit_bytes=vmem_limit),
    )(bands, Wg, b2, alpha1)

    # (N, Cout, Ho_pad*Wo) is already NCHW-ordered memory; drop padded rows (if any).
    if Ho_pad > Ho:
        out = out[:, :, :Ho * Wo]
    return out.reshape(N, Cout, Ho, Wo)


def _reference(x_nchw, weight, bias, alpha):
    y = lax.conv_general_dilated(
        x_nchw, weight, window_strides=(2, 2), padding=((1, 1), (1, 1)),
        dimension_numbers=("NCHW", "OIHW", "NCHW"),
        precision=lax.Precision.HIGHEST)
    y = y + bias.reshape(1, -1, 1, 1)
    return jnp.where(y >= 0.0, y, alpha * y)


if __name__ == "__main__":
    # small shapes consistent with the module
    N, C, H, W = 2, 4, 16, 16
    Cout = 2 * C

    key = jax.random.PRNGKey(0)
    kx_, kw_, kb_ = jax.random.split(key, 3)

    x = jax.random.normal(kx_, (N, C, H, W), dtype=jnp.float32)

    # deterministic, PyTorch-like init: uniform(-1/sqrt(fan_in), 1/sqrt(fan_in))
    fan_in = C * 3 * 3
    bound = 1.0 / math.sqrt(fan_in)
    weight = jax.random.uniform(kw_, (Cout, C, 3, 3), jnp.float32, -bound, bound)
    bias = jax.random.uniform(kb_, (Cout,), jnp.float32, -bound, bound)
    alpha = 0.25  # nn.PReLU() default single shared slope

    out = jax.block_until_ready(down_forward(x, weight, bias, alpha))
    assert out.shape == (N, Cout, H // 2, W // 2), out.shape

    # Reference on the same bf16-quantized operands (kernel accumulates in f32),
    # so the check isolates kernel correctness from the bf16 input cast.
    xq = x.astype(jnp.bfloat16).astype(jnp.float32)
    wq = weight.astype(jnp.bfloat16).astype(jnp.float32)
    ref = _reference(xq, wq, bias, alpha)
    err = float(jnp.max(jnp.abs(out - ref)))
    assert err < 1e-3, err

    print("KERNEL_OK")
</pallas_src>

<mosaic_0001>
module attributes {stable_mosaic.version = 11 : i64} {
  func.func @_down_kernel(%arg0: i32, %arg1: i32, %arg2: memref<1x1x9x9x16xbf16, #tpu.memory_space<vmem>>, %arg3: memref<4x16x8xbf16, #tpu.memory_space<vmem>>, %arg4: memref<1x8xf32, #tpu.memory_space<vmem>>, %arg5: memref<1xf32, #tpu.memory_space<smem>>, %arg6: memref<1x8x64xf32, #tpu.memory_space<vmem>>) attributes {dimension_semantics = [#tpu.dimension_semantics<parallel>, #tpu.dimension_semantics<parallel>], iteration_bounds = array<i64: 2, 1>, scalar_prefetch = 0 : i64, scratch_operands = 0 : i64, tpu.core_type = #tpu.core_type<tc>, window_params = [{transform_indices = @transform_0, window_bounds = array<i64: 1, 1, 9, 9, 16>}, {pipeline_mode = #tpu.pipeline_mode<synchronous>, transform_indices = @transform_1, window_bounds = array<i64: 4, 16, 8>}, {pipeline_mode = #tpu.pipeline_mode<synchronous>, transform_indices = @transform_2, window_bounds = array<i64: 1, 8>}, {transform_indices = @transform_3, window_bounds = array<i64: 1>}, {transform_indices = @transform_4, window_bounds = array<i64: 1, 8, 64>}]} {
    %c0 = arith.constant 0 : index
    %c0_0 = arith.constant 0 : index
    %c0_1 = arith.constant 0 : index
    %c0_2 = arith.constant 0 : index
    %c0_3 = arith.constant 0 : index
    %0 = vector.load %arg2[%c0, %c0_0, %c0_1, %c0_2, %c0_3] : memref<1x1x9x9x16xbf16, #tpu.memory_space<vmem>>, vector<1x1x8x8x16xbf16>
    %1 = vector.shape_cast %0 : vector<1x1x8x8x16xbf16> to vector<8x8x16xbf16>
    %2 = vector.shape_cast %1 : vector<8x8x16xbf16> to vector<64x16xbf16>
    %c0_4 = arith.constant 0 : index
    %c0_5 = arith.constant 0 : index
    %c0_6 = arith.constant 0 : index
    %3 = vector.load %arg3[%c0_4, %c0_5, %c0_6] : memref<4x16x8xbf16, #tpu.memory_space<vmem>>, vector<1x16x8xbf16>
    %4 = vector.shape_cast %3 : vector<1x16x8xbf16> to vector<16x8xbf16>
    %cst = arith.constant dense<0.000000e+00> : vector<64x8xf32>
    %5 = tpu.matmul %2, %4, %cst {dimension_numbers = #tpu.dot_dimension_numbers<[1], [0], [0], [1], [0, 0, 1, 1], [], []>} : vector<64x16xbf16>, vector<16x8xbf16>, vector<64x8xf32> -> vector<64x8xf32>
    %c0_7 = arith.constant 0 : index
    %c0_8 = arith.constant 0 : index
    %c0_9 = arith.constant 0 : index
    %c1 = arith.constant 1 : index
    %c0_10 = arith.constant 0 : index
    %6 = vector.load %arg2[%c0_7, %c0_8, %c0_9, %c1, %c0_10] : memref<1x1x9x9x16xbf16, #tpu.memory_space<vmem>>, vector<1x1x8x8x16xbf16>
    %7 = vector.shape_cast %6 : vector<1x1x8x8x16xbf16> to vector<8x8x16xbf16>
    %8 = vector.shape_cast %7 : vector<8x8x16xbf16> to vector<64x16xbf16>
    %c1_11 = arith.constant 1 : index
    %c0_12 = arith.constant 0 : index
    %c0_13 = arith.constant 0 : index
    %9 = vector.load %arg3[%c1_11, %c0_12, %c0_13] : memref<4x16x8xbf16, #tpu.memory_space<vmem>>, vector<1x16x8xbf16>
    %10 = vector.shape_cast %9 : vector<1x16x8xbf16> to vector<16x8xbf16>
    %cst_14 = arith.constant dense<0.000000e+00> : vector<64x8xf32>
    %11 = tpu.matmul %8, %10, %cst_14 {dimension_numbers = #tpu.dot_dimension_numbers<[1], [0], [0], [1], [0, 0, 1, 1], [], []>} : vector<64x16xbf16>, vector<16x8xbf16>, vector<64x8xf32> -> vector<64x8xf32>
    %12 = arith.addf %5, %11 : vector<64x8xf32>
    %c0_15 = arith.constant 0 : index
    %c0_16 = arith.constant 0 : index
    %c1_17 = arith.constant 1 : index
    %c0_18 = arith.constant 0 : index
    %c0_19 = arith.constant 0 : index
    %13 = vector.load %arg2[%c0_15, %c0_16, %c1_17, %c0_18, %c0_19] : memref<1x1x9x9x16xbf16, #tpu.memory_space<vmem>>, vector<1x1x8x8x16xbf16>
    %14 = vector.shape_cast %13 : vector<1x1x8x8x16xbf16> to vector<8x8x16xbf16>
    %15 = vector.shape_cast %14 : vector<8x8x16xbf16> to vector<64x16xbf16>
    %c2 = arith.constant 2 : index
    %c0_20 = arith.constant 0 : index
    %c0_21 = arith.constant 0 : index
    %16 = vector.load %arg3[%c2, %c0_20, %c0_21] : memref<4x16x8xbf16, #tpu.memory_space<vmem>>, vector<1x16x8xbf16>
    %17 = vector.shape_cast %16 : vector<1x16x8xbf16> to vector<16x8xbf16>
    %cst_22 = arith.constant dense<0.000000e+00> : vector<64x8xf32>
    %18 = tpu.matmul %15, %17, %cst_22 {dimension_numbers = #tpu.dot_dimension_numbers<[1], [0], [0], [1], [0, 0, 1, 1], [], []>} : vector<64x16xbf16>, vector<16x8xbf16>, vector<64x8xf32> -> vector<64x8xf32>
    %19 = arith.addf %12, %18 : vector<64x8xf32>
    %c0_23 = arith.constant 0 : index
    %c0_24 = arith.constant 0 : index
    %c1_25 = arith.constant 1 : index
    %c1_26 = arith.constant 1 : index
    %c0_27 = arith.constant 0 : index
    %20 = vector.load %arg2[%c0_23, %c0_24, %c1_25, %c1_26, %c0_27] : memref<1x1x9x9x16xbf16, #tpu.memory_space<vmem>>, vector<1x1x8x8x16xbf16>
    %21 = vector.shape_cast %20 : vector<1x1x8x8x16xbf16> to vector<8x8x16xbf16>
    %22 = vector.shape_cast %21 : vector<8x8x16xbf16> to vector<64x16xbf16>
    %c3 = arith.constant 3 : index
    %c0_28 = arith.constant 0 : index
    %c0_29 = arith.constant 0 : index
    %23 = vector.load %arg3[%c3, %c0_28, %c0_29] : memref<4x16x8xbf16, #tpu.memory_space<vmem>>, vector<1x16x8xbf16>
    %24 = vector.shape_cast %23 : vector<1x16x8xbf16> to vector<16x8xbf16>
    %cst_30 = arith.constant dense<0.000000e+00> : vector<64x8xf32>
    %25 = tpu.matmul %22, %24, %cst_30 {dimension_numbers = #tpu.dot_dimension_numbers<[1], [0], [0], [1], [0, 0, 1, 1], [], []>} : vector<64x16xbf16>, vector<16x8xbf16>, vector<64x8xf32> -> vector<64x8xf32>
    %26 = arith.addf %19, %25 : vector<64x8xf32>
    %c0_31 = arith.constant 0 : index
    %c0_32 = arith.constant 0 : index
    %27 = vector.load %arg4[%c0_31, %c0_32] : memref<1x8xf32, #tpu.memory_space<vmem>>, vector<1x8xf32>
    %28 = vector.broadcast %27 : vector<1x8xf32> to vector<64x8xf32>
    %29 = arith.addf %26, %28 : vector<64x8xf32>
    %c0_33 = arith.constant 0 : index
    %30 = memref.load %arg5[%c0_33] : memref<1xf32, #tpu.memory_space<smem>>
    %cst_34 = arith.constant 0.000000e+00 : f32
    %31 = vector.broadcast %cst_34 : f32 to vector<64x8xf32>
    %32 = arith.cmpf oge, %29, %31 : vector<64x8xf32>
    %33 = vector.broadcast %30 : f32 to vector<64x8xf32>
    %34 = arith.mulf %33, %29 : vector<64x8xf32>
    %35 = arith.select %32, %29, %34 : vector<64x8xi1>, vector<64x8xf32>
    %36 = tpu.transpose %35, [1, 0] : vector<64x8xf32> -> vector<8x64xf32>
    %c0_35 = arith.constant 0 : index
    %c0_36 = arith.constant 0 : index
    %c0_37 = arith.constant 0 : index
    %37 = vector.load %arg6[%c0_35, %c0_36, %c0_37] : memref<1x8x64xf32, #tpu.memory_space<vmem>>, vector<1x8x64xf32>
    %38 = vector.shape_cast %37 : vector<1x8x64xf32> to vector<8x64xf32>
    %39 = vector.shape_cast %36 : vector<8x64xf32> to vector<1x8x64xf32>
    tpu.vector_store %arg6[%c0_35, %c0_36, %c0_37], %39 {strides = array<i32>} : memref<1x8x64xf32, #tpu.memory_space<vmem>>, vector<1x8x64xf32>,
    return
  }
  func.func @transform_0(%arg0: i32, %arg1: i32) -> (i32, i32, i32, i32, i32) {
    %c0_i32 = arith.constant 0 : i32
    %c0_i32_0 = arith.constant 0 : i32
    %c0_i32_1 = arith.constant 0 : i32
    %c0_i32_2 = arith.constant 0 : i32
    return %arg0, %arg1, %c0_i32, %c0_i32_0, %c0_i32_1 : i32, i32, i32, i32, i32
  }
  func.func @transform_1(%arg0: i32, %arg1: i32) -> (i32, i32, i32) {
    %c0_i32 = arith.constant 0 : i32
    %c0_i32_0 = arith.constant 0 : i32
    %c0_i32_1 = arith.constant 0 : i32
    %c0_i32_2 = arith.constant 0 : i32
    return %c0_i32, %c0_i32_0, %c0_i32_1 : i32, i32, i32
  }
  func.func @transform_2(%arg0: i32, %arg1: i32) -> (i32, i32) {
    %c0_i32 = arith.constant 0 : i32
    %c0_i32_0 = arith.constant 0 : i32
    %c0_i32_1 = arith.constant 0 : i32
    return %c0_i32, %c0_i32_0 : i32, i32
  }
  func.func @transform_3(%arg0: i32, %arg1: i32) -> i32 {
    %c0_i32 = arith.constant 0 : i32
    %c0_i32_0 = arith.constant 0 : i32
    return %c0_i32 : i32
  }
  func.func @transform_4(%arg0: i32, %arg1: i32) -> (i32, i32, i32) {
    %c0_i32 = arith.constant 0 : i32
    %c0_i32_0 = arith.constant 0 : i32
    return %arg0, %c0_i32, %arg1 : i32, i32, i32
  }
}

</mosaic_0001>

<bundles_post_ra>
// kernel: tpu_custom_call.1
= control target key start
LH: loop header
LB: loop body
LE: loop exit
PB: predicated region body
PF: predicated region fallthrough
CT: control target
= control target key end

     0   :  { %s1615_s0 = inlined_call_operand.vmem [shape: bf16[2,1,9,9,16], index: 0, kind: input, shape index: {}]   ;;  %s1616_s1 = inlined_call_operand.vmem [shape: bf16[4,16,8], index: 1, kind: input, shape index: {}]   ;;  %s1617_s2 = inlined_call_operand.vmem [shape: f32[1,8], index: 2, kind: input, shape index: {}]   ;;  %s1618_s3 = inlined_call_operand.<no memory space> [shape: f32[1], index: 3, kind: input, shape index: {}]   ;;  %s1619_s4 = inlined_call_operand.hbm [shape: f32[2,8,64], index: 4, kind: output, shape index: {}]  }
   0x1   :  { %9 = sst [smem:[#allocation2]] %s1618_s3 }
   0x2   :  { %10 = vsyncpa [#allocation4], 0 }
   0x3   :  { %12 = vsyncpa [#allocation4 + $0x1], 0  ;;  %s1399_s17 = smov 0   ;;  %s1401_s18 = smov 0  }
   0x4   :  { %s1403_s19 = smov 0   ;;  %s1405_s20 = smov 0  }
   0x5   :  { %s1407_s21 = smov 0   ;;  %s1409_s22 = smov 0  }
   0x6 LB: > { %s1085_s3 = sadd.s32 4294967295, %s1368_s22   ;;  %s1086_s23 = sadd.s32 4294967294, %s1368_s22   ;;  %s1368_s22 = sphi %s1409_s22, %s18_s22   ;;  %s1364_s21 = sphi %s1407_s21, %s1628_s21   ;;  %s1360_s20 = sphi %s1405_s20, %s1627_s20   ;;  %s1356_s19 = sphi %s1403_s19, %s1626_s19   ;;  %s1352_s18 = sphi %s1401_s18, %s1625_s18   ;;  %s1348_s17 = sphi %s1399_s17, %s1624_s17  }
   0x7   : > { %s30_s24 = sadd.s32 1, %s1364_s21  ;;  %s130_s25 = sadd.s32 1, %s1356_s19 }
   0x8   : > { %p32_p0 = scmp.ge.s32.totalorder %s30_s24, 2  ;;  %p140_p1 = scmp.ne.s32.totalorder %s1356_s19, %s1352_s18 }
   0x9   : > { %p141_p2 = scmp.eq.s32.totalorder %s1085_s3, 1  ;;  %p146_p3 = scmp.ne.s32.totalorder %s1352_s18, %s1348_s17 }
   0xa   : > { %s1630_s24 = smov (%p32_p0, %s30_s24), 0  ;;  %p147_p5 = scmp.eq.s32.totalorder %s1086_s23, 1 }
   0xb   : > { %p1439_p4 = por %p141_p2, %p140_p1  ;;  %s125_s27 = ssub.s32 %s1364_s21, %s1630_s24 }
   0xc   : > { %p1089_p6 = scmp.ge.s32.totalorder %s1368_s22, 1  ;;  %p128_p7 = scmp.eq.s32.totalorder %s125_s27, 0 }
   0xd   : > { %p1446_p8 = por %p147_p5, %p146_p3  ;;  %p186_p9 = scmp.lt.s32.totalorder %s1368_s22, 3 }
   0xe   : > { %s1452_s29 = scalar_select %p128_p7, %s1356_s19, %s130_s25  }
   0xf   : > { %p187_p10 = pnand %p1089_p6, %p186_p9 }
  0x10   : > { %p216_p11 = scmp.lt.s32.totalorder (!%p187_p10), %s1360_s20, 1  ;;  %s933_s3 = sld [smem:[#allocation2]] (!%p187_p10) }
  0x11   : > { %190 = sbr.rel (%p187_p10) target bundleno = 403 (0x193), region = 36  ;;  %s213_s27 = sand.u32 (!%p187_p10), 1, %s1352_s18  }
  0x12   : > { %s1090_s30 = sshll.u32 (!%p187_p10), %s213_s27, 3  ;;  %s1160_s5 = sshll.u32 (!%p187_p10), %s1360_s20, 7 }
  0x13   : > { %s215_s6 = scalar_lea.vmem (!%p187_p10), [#allocation3], %s1090_s30  ;;  %s1575_s10 = scalar_lea.hbm (!%p187_p10), %s1619_s4, %s1160_s5 }
  0x14   : > { %s1008_s7 = sshll.u32 (!%p187_p10), %s215_s6, 4  ;;  %s1370_s13 = smov (!%p187_p10), [#allocation3]   ;;  %s1009_s7 = int_to_ptr.vmem [resolvable:$true] %s1008_s7 }
  0x15   : > { %s1292_s12 = scalar_lea.vmem (!%p187_p10), %s1009_s7, 128  ;;  %s1296_s14 = sshll.u32 (!%p187_p10), %s1370_s13, 4  ;;  %s1297_s14 = int_to_ptr.vmem [resolvable:$false] %s1296_s14 }
  0x16   : > { %v1280_v0 = vld [vmem:[%s1616_s1] sm:$0xff]   ;;  %v1281_v1 = vld [vmem:[%s1616_s1 + $0x8] sm:$0xff]   ;;  %s217_s8 = scalar_select %p216_p11, %s1360_s20, 1  ;;  %v1465_v2 = vld [vmem:[%s1616_s1 + $0x10] sm:$0xff]   ;;  %vm380_vm0 = vcmask 130048   ;;  %vm991_vm12 = vcmask 523264  }
  0x17   : > { %1193 = vmatprep.subr.bf16.mxu1 %v1280_v0  ;;  %1183 = vmatprep.subr.bf16.mxu0 %v1281_v1  ;;  %v1285_v3 = vld [vmem:[%s1616_s1 + $0x18] sm:$0xff]   ;;  %vm244_vm1 = vsmask.f32 3328  ;;  %vm245_vm2 = vsmask.f32 7440  ;;  %p1293_p12 = scmp.ne.s32.totalorder %s1009_s7, %s1292_s12  ;;  %s1298_s20 = scalar_lea.vmem %s1297_s14, 256 }
  0x18   : > { %1194 = vmatpush3.bf16.msra.mxu1 %v1280_v0  ;;  %s1223_s11 = smul.u32 72, %s217_s8  ;;  %1184 = vmatpush3.bf16.msra.mxu0 %v1281_v1  ;;  %vm1487_vm3 = vmor %vm244_vm1, %vm245_vm2  ;;  %p1299_p1 = scmp.lt.s32.totalorder %s1009_s7, %s1297_s14 }
  0x19   : > { %1203 = vmatprep.subr.bf16.mxu0 %v1465_v2  ;;  %1213 = vmatprep.subr.bf16.mxu1 %v1285_v3  ;;  %p1294_p13 = pnand %p1293_p12, %p1439_p4  ;;  %p1300_p2 = scmp.lt.s32.totalorder %s1298_s20, %s1292_s12 }
  0x1a   : > { %s1474_s16 = scalar_lea.vmem %s1615_s0, %s1223_s11  ;;  %s994_s11 = scalar_lea.sflag [#allocation4], %s213_s27 }
  0x1b   : > { %v226_v4 = vld [vmem:[%s1474_s16] sm:$0xf]  ;;  %v227_v5 = vld [vmem:[%s1474_s16 + $0x8] sm:$0xf]  ;;  %v228_v6 = vld [vmem:[%s1474_s16 + $0x10] sm:$0xf]  ;;  %p1295_p0 = pneg %p1294_p13  ;;  %p1301_p3 = por %p1300_p2, %p1299_p1 }
  0x1c   : > { %v248_v7 = vshrl.u32 %v226_v4, 16  ;;  %v251_v8 = vshll.u32 %v226_v4, 16  ;;  %v262_v9 = vshrl.u32 %v227_v5, 16  ;;  %v265_v10 = vshll.u32 %v227_v5, 16  ;;  %v229_v11 = vld [vmem:[%s1474_s16 + $0x18] sm:$0xf] }
  0x1d   : > { %v1103_v12 = vcombine.low %v226_v4, %v227_v5  ;;  %v276_v13 = vshrl.u32 %v228_v6, 16  ;;  %v279_v14 = vshll.u32 %v228_v6, 16  ;;  %v290_v15 = vshrl.u32 %v229_v11, 16  ;;  %v236_v16 = vld [vmem:[%s1474_s16 + $0x4] sm:$0x1]  ;;  %p1302_p5 = pnand %p1301_p3, %p1295_p0 }
  0x1e   : > { %v250_v17 = vrot.slane %v248_v7, 4  ;;  %v253_v18 = vrot.slane %v251_v8, 5  ;;  %v264_v19 = vrot.slane %v262_v9, 4  ;;  %v267_v20 = vrot.slane %v265_v10, 5  ;;  %v237_v21 = vld [vmem:[%s1474_s16 + $0xc] sm:$0x1] }
  0x1f   : > { %1195 = vmatprep.mubr.msk.bf16.mxu1 %vm380_vm0, %v1103_v12  ;;  %v278_v22 = vrot.slane %v276_v13, 4  ;;  %v281_v23 = vrot.slane %v279_v14, 5  ;;  %v292_v24 = vrot.slane %v290_v15, 4  ;;  %v293_v25 = vshll.u32 %v229_v11, 16  ;;  %v238_v26 = vld [vmem:[%s1474_s16 + $0x14] sm:$0x1] }
  0x20   : > { %v1104_v27 = vcombine.low %v228_v6, %v229_v11  ;;  %v254_v28 = vor.u32 %v253_v18, %v250_v17  ;;  %v257_v29 = vshll.u32 %v236_v16, 16  ;;  %v268_v30 = vor.u32 %v267_v20, %v264_v19  ;;  %v239_v31 = vld [vmem:[%s1474_s16 + $0x1c] sm:$0x1]  ;;  %v230_v37 = vld [vmem:[%s1474_s16 + $0x20] sm:$0xf] }
  0x21   : > { %v295_v32 = vrot.slane %v293_v25, 5  ;;  %v271_v34 = vshll.u32 %v237_v21, 16  ;;  %v282_v35 = vor.u32 %v281_v23, %v278_v22  ;;  %v285_v36 = vshll.u32 %v238_v26, 16  ;;  %v231_v42 = vld [vmem:[%s1474_s16 + $0x28] sm:$0xf] }
  0x22   : > { %1196 = vmatmul.mubr.msk.bf16.vlgmr.msra.gmra.mxu1 %vm380_vm0, %v1104_v27  ;;  %v255_v38 = vrot.slane %v254_v28, 4  ;;  %v259_v39 = vrot.slane %v257_v29, 5  ;;  %v269_v40 = vrot.slane %v268_v30, 4  ;;  %v299_v41 = vshll.u32 %v239_v31, 16  ;;  %v232_v51 = vld [vmem:[%s1474_s16 + $0x30] sm:$0xf] }
  0x23   : > { %v273_v43 = vrot.slane %v271_v34, 5  ;;  %v283_v44 = vrot.slane %v282_v35, 4  ;;  %v287_v45 = vrot.slane %v285_v36, 5  ;;  %v296_v46 = vor.u32 %v295_v32, %v292_v24  ;;  %1214 = vmatpush3.bf16.msra.mxu1 %v1285_v3  ;;  %v233_v56 = vld [vmem:[%s1474_s16 + $0x38] sm:$0xf] }
  0x24   : > { %v260_v47 = vsel %vm1487_vm3, %v255_v38, %v259_v39  ;;  %v301_v48 = vrot.slane %v299_v41, 5  ;;  %v304_v49 = vshrl.u32 %v230_v37, 16  ;;  %v307_v50 = vshll.u32 %v230_v37, 16  ;;  %v240_v1 = vld [vmem:[%s1474_s16 + $0x24] sm:$0x1] }
  0x25   : > { %v274_v52 = vsel %vm1487_vm3, %v269_v40, %v273_v43  ;;  %v288_v53 = vsel %vm1487_vm3, %v283_v44, %v287_v45  ;;  %v297_v54 = vrot.slane %v296_v46, 4  ;;  %v318_v55 = vshrl.u32 %v231_v42, 16  ;;  %v241_v3 = vld [vmem:[%s1474_s16 + $0x2c] sm:$0x1]  ;;  %v242_v8 = vld [vmem:[%s1474_s16 + $0x34] sm:$0x1] }
  0x26   : > { %v1094_v57 = vcombine.low %v260_v47, %v274_v52  ;;  %v306_v58 = vrot.slane %v304_v49, 4  ;;  %v309_v59 = vrot.slane %v307_v50, 5  ;;  %v321_v60 = vshll.u32 %v231_v42, 16  ;;  %v243_v13 = vld [vmem:[%s1474_s16 + $0x3c] sm:$0x1] }
  0x27   : > { %v302_v61 = vsel %vm1487_vm3, %v297_v54, %v301_v48  ;;  %v320_v62 = vrot.slane %v318_v55, 4  ;;  %v1105_v63 = vcombine.low %v230_v37, %v231_v42  ;;  %v332_v0 = vshrl.u32 %v232_v51, 16  ;;  %v1131_v14 = vld [vmem:[%s1474_s16 + $0x8] sm:$0xf]  ;;  %v1132_v19 = vld [vmem:[%s1474_s16 + $0xc] sm:$0x1] }
  0x28   : > { %1185 = vmatprep.mubr.msk.bf16.mxu0 %vm380_vm0, %v1094_v57  ;;  %v1095_v4 = vcombine.low %v288_v53, %v302_v61  ;;  %v323_v5 = vrot.slane %v321_v60, 5  ;;  %v335_v6 = vshll.u32 %v232_v51, 16  ;;  %v346_v7 = vshrl.u32 %v233_v56, 16  ;;  %v1133_v24 = vld [vmem:[%s1474_s16 + $0x10] sm:$0xf] }
  0x29   : > { %1199 = vmatprep.mubr.msk.bf16.mxu1 %vm380_vm0, %v1105_v63  ;;  %v334_v9 = vrot.slane %v332_v0, 4  ;;  %v349_v10 = vshll.u32 %v233_v56, 16  ;;  %v1106_v11 = vcombine.low %v232_v51, %v233_v56  ;;  %v310_v12 = vor.u32 %v309_v59, %v306_v58  ;;  %v1134_v29 = vld [vmem:[%s1474_s16 + $0x14] sm:$0x1]  ;;  %v1136_v39 = vld [vmem:[%s1474_s16 + $0x1c] sm:$0x1] }
  0x2a   : > { %1186 = vmatmul.mubr.msk.bf16.vlgmr.msra.gmra.mxu0 %vm380_vm0, %v1095_v4  ;;  %v337_v15 = vrot.slane %v335_v6, 5  ;;  %v348_v16 = vrot.slane %v346_v7, 4  ;;  %v313_v17 = vshll.u32 %v240_v1, 16  ;;  %v324_v18 = vor.u32 %v323_v5, %v320_v62  ;;  %v1137_v44 = vld [vmem:[%s1474_s16 + $0x20] sm:$0xf] }
  0x2b   : > { %1204 = vmatpush3.bf16.msra.mxu0 %v1465_v2  ;;  %v351_v20 = vrot.slane %v349_v10, 5  ;;  %1200 = vmatmul.mubr.msk.bf16.gmra.mxu1 %vm380_vm0, %v1106_v11  ;;  %v311_v21 = vrot.slane %v310_v12, 4  ;;  %v327_v22 = vshll.u32 %v241_v3, 16  ;;  %v341_v23 = vshll.u32 %v242_v8, 16  ;;  %v1135_v2 = vld [vmem:[%s1474_s16 + $0x18] sm:$0xf] }
  0x2c   : > { %v315_v25 = vrot.slane %v313_v17, 5  ;;  %v325_v26 = vrot.slane %v324_v18, 4  ;;  %v338_v27 = vor.u32 %v337_v15, %v334_v9  ;;  %v355_v28 = vshll.u32 %v243_v13, 16  ;;  %v1138_v52 = vld [vmem:[%s1474_s16 + $0x24] sm:$0x1] }
  0x2d   : > { %v329_v30 = vrot.slane %v327_v22, 5  ;;  %v343_v31 = vrot.slane %v341_v23, 5  ;;  %v352_v32 = vor.u32 %v351_v20, %v348_v16  ;;  %v701_v34 = vshrl.u32 %v1131_v14, 16  ;;  %v1288_v53 = vld [vmem:[%s1474_s16 + $0x8] ss:$8 sps:$4 sm:$0xff]  }
  0x2e   : > { %v316_v35 = vsel %vm1487_vm3, %v311_v21, %v315_v25  ;;  %v339_v36 = vrot.slane %v338_v27, 4  ;;  %v357_v37 = vrot.slane %v355_v28, 5  ;;  %v704_v38 = vshll.u32 %v1131_v14, 16  ;;  %v1289_v10 = vld [vmem:[%s1474_s16 + $0x18] ss:$8 sps:$4 sm:$0xff]  }
  0x2f   : > { %v330_v40 = vsel %vm1487_vm3, %v325_v26, %v329_v30  ;;  %v353_v41 = vrot.slane %v352_v32, 4  ;;  %v703_v42 = vrot.slane %v701_v34, 4  ;;  %v710_v43 = vshll.u32 %v1132_v19, 16  ;;  %v1139_v11 = vld [vmem:[%s1474_s16 + $0x28] sm:$0xf] }
  0x30   : > { %v1096_v45 = vcombine.low %v316_v35, %v330_v40  ;;  %v344_v46 = vsel %vm1487_vm3, %v339_v36, %v343_v31  ;;  %v706_v47 = vrot.slane %v704_v38, 5  ;;  %v715_v48 = vshrl.u32 %v1133_v24, 16  ;;  %v1290_v16 = vld [vmem:[%s1474_s16 + $0x28] ss:$8 sps:$4 sm:$0xff]   ;;  %v1140_v17 = vld [vmem:[%s1474_s16 + $0x2c] sm:$0x1] }
  0x31   : > { %v358_v49 = vsel %vm1487_vm3, %v353_v41, %v357_v37  ;;  %v718_v50 = vshll.u32 %v1133_v24, 16  ;;  %v724_v51 = vshll.u32 %v1134_v29, 16  ;;  %v729_v57 = vshrl.u32 %v1135_v2, 16  ;;  %v1141_v18 = vld [vmem:[%s1474_s16 + $0x30] sm:$0xf] }
  0x32   : > { %1189 = vmatprep.mubr.msk.bf16.mxu0 %vm380_vm0, %v1096_v45  ;;  %v1097_v54 = vcombine.low %v344_v46, %v358_v49  ;;  %v707_v55 = vor.u32 %v706_v47, %v703_v42  ;;  %v717_v56 = vrot.slane %v715_v48, 4  ;;  %v712_v58 = vrot.slane %v710_v43, 5  ;;  %v1142_v20 = vld [vmem:[%s1474_s16 + $0x34] sm:$0x1]  ;;  %v1143_v28 = vld [vmem:[%s1474_s16 + $0x38] sm:$0xf] }
  0x33   : > { %v720_v59 = vrot.slane %v718_v50, 5  ;;  %v732_v60 = vshll.u32 %v1135_v2, 16  ;;  %v738_v61 = vshll.u32 %v1136_v39, 16  ;;  %v731_v63 = vrot.slane %v729_v57, 4  ;;  %v1144_v34 = vld [vmem:[%s1474_s16 + $0x3c] sm:$0x1] }
  0x34   : > { %1190 = vmatmul.mubr.msk.bf16.gmra.mxu0 %vm380_vm0, %v1097_v54  ;;  %v708_v62 = vrot.slane %v707_v55, 4  ;;  %v743_v0 = vshrl.u32 %v1137_v44, 16  ;;  %v746_v1 = vshll.u32 %v1137_v44, 16  ;;  %v726_v4 = vrot.slane %v724_v51, 5  ;;  %v1145_v38 = vld [vmem:[%s1474_s16 + $0x40] sm:$0xf] }
  0x35   : > { %v721_v3 = vor.u32 %v720_v59, %v717_v56  ;;  %v734_v5 = vrot.slane %v732_v60, 5  ;;  %v752_v6 = vshll.u32 %v1138_v52, 16  ;;  %1205 = vmatprep.mubr.msk.bf16.mxu0 %vm380_vm0, %v1288_v53  ;;  %v740_v7 = vrot.slane %v738_v61, 5  ;;  %v1146_v45 = vld [vmem:[%s1474_s16 + $0x44] sm:$0x1] }
  0x36   : > { %v745_v8 = vrot.slane %v743_v0, 4  ;;  %v748_v9 = vrot.slane %v746_v1, 5  ;;  %v713_v12 = vsel %vm1487_vm3, %v708_v62, %v712_v58  ;;  %v757_v21 = vshrl.u32 %v1139_v11, 16  ;;  %v1291_v55 = vld [vmem:[%s1474_s16 + $0x38] ss:$8 sps:$4 sm:$0xff]  }
  0x37   : > { %v722_v13 = vrot.slane %v721_v3, 4  ;;  %v735_v14 = vor.u32 %v734_v5, %v731_v63  ;;  %v754_v15 = vrot.slane %v752_v6, 5  ;;  %v760_v22 = vshll.u32 %v1139_v11, 16 }
  0x38   : > { %v749_v19 = vor.u32 %v748_v9, %v745_v8  ;;  %v766_v23 = vshll.u32 %v1140_v17, 16  ;;  %v771_v26 = vshrl.u32 %v1141_v18, 16  ;;  %v774_v27 = vshll.u32 %v1141_v18, 16 }
  0x39   : > { %v727_v24 = vsel %vm1487_vm3, %v722_v13, %v726_v4  ;;  %v736_v25 = vrot.slane %v735_v14, 4  ;;  %v759_v31 = vrot.slane %v757_v21, 4  ;;  %v762_v32 = vrot.slane %v760_v22, 5 }
  0x3a   : > { %v1149_v29 = vcombine.low %v713_v12, %v727_v24  ;;  %v750_v30 = vrot.slane %v749_v19, 4  ;;  %v768_v35 = vrot.slane %v766_v23, 5  ;;  %v773_v36 = vrot.slane %v771_v26, 4 }
  0x3b   : > { %v741_v2 = vsel %vm1487_vm3, %v736_v25, %v740_v7  ;;  %v776_v37 = vrot.slane %v774_v27, 5  ;;  %v763_v40 = vor.u32 %v762_v32, %v759_v31  ;;  %v780_v41 = vshll.u32 %v1142_v20, 16 }
  0x3c   : > { %1215 = vmatprep.mubr.msk.bf16.mxu1 %vm380_vm0, %v1149_v29  ;;  %v755_v39 = vsel %vm1487_vm3, %v750_v30, %v754_v15  ;;  %1206 = vmatmul.mubr.msk.bf16.vlgmr.msra.gmra.mxu0 %vm380_vm0, %v1289_v10  ;;  %v785_v42 = vshrl.u32 %v1143_v28, 16  ;;  %v788_v46 = vshll.u32 %v1143_v28, 16  ;;  %v794_v47 = vshll.u32 %v1144_v34, 16 }
  0x3d   : > { %v1150_v43 = vcombine.low %v741_v2, %v755_v39  ;;  %1209 = vmatprep.mubr.msk.bf16.mxu0 %vm380_vm0, %v1290_v16  ;;  %v777_v44 = vor.u32 %v776_v37, %v773_v36  ;;  %v764_v48 = vrot.slane %v763_v40, 4  ;;  %v782_v49 = vrot.slane %v780_v41, 5  ;;  %v1158_v36 = vld [vmem:[%s1617_s2] ss:$0 sm:$0xff] }
  0x3e   : > { %v787_v50 = vrot.slane %v785_v42, 4  ;;  %v799_v51 = vshrl.u32 %v1145_v38, 16  ;;  %v790_v53 = vrot.slane %v788_v46, 5  ;;  %v802_v54 = vshll.u32 %v1145_v38, 16 }
  0x3f   : > { %1216 = vmatmul.mubr.msk.bf16.vlgmr.msra.gmra.mxu1 %vm380_vm0, %v1150_v43  ;;  %v778_v52 = vrot.slane %v777_v44, 4  ;;  %v769_v56 = vsel %vm1487_vm3, %v764_v48, %v768_v35  ;;  %v808_v58 = vshll.u32 %v1146_v45, 16  ;;  %v796_v61 = vrot.slane %v794_v47, 5 }
  0x40   : > { %v801_v57 = vrot.slane %v799_v51, 4  ;;  %v791_v60 = vor.u32 %v790_v53, %v787_v50  ;;  %v804_v62 = vrot.slane %v802_v54, 5  ;;  %v942_v44 = vstv %s933_s3 }
  0x41   : > { %v783_v59 = vsel %vm1487_vm3, %v778_v52, %v782_v49  ;;  %v810_v3 = vrot.slane %v808_v58, 5 }
  0x42   : > { %v1151_v63 = vcombine.low %v769_v56, %v783_v59  ;;  %v792_v0 = vrot.slane %v791_v60, 4  ;;  %v805_v1 = vor.u32 %v804_v62, %v801_v57 }
  0x44   : > { %1210 = vmatmul.mubr.msk.bf16.gmra.mxu0 %vm380_vm0, %v1291_v55  ;;  %1219 = vmatprep.mubr.msk.bf16.mxu1 %vm380_vm0, %v1151_v63  ;;  %v797_v4 = vsel %vm1487_vm3, %v792_v0, %v796_v61  ;;  %v806_v5 = vrot.slane %v805_v1, 4 }
  0x46   : > { %v811_v6 = vsel %vm1487_vm3, %v806_v5, %v810_v3 }
  0x47   : > { %v1152_v7 = vcombine.low %v797_v4, %v811_v6 }
  0x49   : > { %1220 = vmatmul.mubr.msk.bf16.gmra.mxu1 %vm380_vm0, %v1152_v7 }
  0xe2   : > { %v1197_v8 = vpop.f32.mrf.mxu1 }
  0xe4   : > { %v530_v9 = vpop.f32.mrf.mxu1 }
  0xe6   : > { %v1198_v10 = vpop.f32.mrf.mxu1 }
  0xe8   : > { %v533_v12 = vpop.f32.mrf.mxu1 }
  0xea   : > { %v1187_v11 = vpop.f32.mrf.mxu0 }
  0xeb   : > { %v1201_v15 = vpop.f32.mrf.mxu1  ;;  %v539_v25 = vadd.f32 %v1197_v8, %v1187_v11 }
  0xec   : > { %v427_v13 = vpop.f32.mrf.mxu0 }
  0xed   : > { %v546_v17 = vpop.f32.mrf.mxu1  ;;  %v531_v24 = vadd.f32 %v530_v9, %v427_v13 }
  0xee   : > { %v1188_v14 = vpop.f32.mrf.mxu0 }
  0xef   : > { %v1202_v20 = vpop.f32.mrf.mxu1  ;;  %v542_v34 = vadd.f32 %v1198_v10, %v1188_v14 }
  0xf0   : > { %v430_v16 = vpop.f32.mrf.mxu0 }
  0xf1   : > { %v549_v33 = vpop.f32.mrf.mxu1  ;;  %v534_v31 = vadd.f32 %v533_v12, %v430_v16 }
  0xf4   : > { %v1191_v18 = vpop.f32.mrf.mxu0 }
  0xf5   : > { %v555_v1 = vadd.f32 %v1201_v15, %v1191_v18 }
  0xf6   : > { %v443_v19 = vpop.f32.mrf.mxu0 }
  0xf7   : > { %v547_v48 = vadd.f32 %v546_v17, %v443_v19 }
  0xf8   : > { %v1192_v21 = vpop.f32.mrf.mxu0 }
  0xf9   : > { %v558_v9 = vadd.f32 %v1202_v20, %v1192_v21 }
  0xfa   : > { %v446_v22 = vpop.f32.mrf.mxu0 }
  0xfb   : > { %v550_v58 = vadd.f32 %v549_v33, %v446_v22 }
  0xfc   : > { %v1207_v23 = vpop.f32.mrf.mxu0 }
  0xfd   : > { %v678_v29 = vadd.f32 %v1207_v23, %v539_v25 }
  0xfe   : > { %v645_v26 = vpop.f32.mrf.mxu0 }
  0xff   : > { %v1217_v27 = vpop.f32.mrf.mxu1  ;;  %v676_v28 = vadd.f32 %v645_v26, %v531_v24 }
 0x100   : > { %v1208_v30 = vpop.f32.mrf.mxu0  ;;  %v912_v39 = vadd.f32 %v1217_v27, %v678_v29 }
 0x101   : > { %v879_v32 = vpop.f32.mrf.mxu1  ;;  %v679_v40 = vadd.f32 %v1208_v30, %v542_v34 }
 0x102   : > { %v910_v2 = vadd.f32 %v879_v32, %v676_v28  ;;  %v648_v35 = vpop.f32.mrf.mxu0  ;;  %v927_v49 = vadd.f32 %v1158_v36, %v912_v39 }
 0x103   : > { %v1218_v37 = vpop.f32.mrf.mxu1  ;;  %v677_v38 = vadd.f32 %v648_v35, %v534_v31 }
 0x104   : > { %v1211_v41 = vpop.f32.mrf.mxu0  ;;  %v925_v42 = vadd.f32 %v1158_v36, %v910_v2  ;;  %v913_v50 = vadd.f32 %v1218_v37, %v679_v40  ;;  %v945_v62 = vmul.f32 %v942_v44, %v927_v49  ;;  %vm936_vm6 = vcmp.ge.f32.partialorder %v927_v49, 0.0 }
 0x105   : > { %v882_v43 = vpop.f32.mrf.mxu1  ;;  %v682_v4 = vadd.f32 %v1211_v41, %v555_v1 }
 0x106   : > { %v911_v45 = vadd.f32 %v882_v43, %v677_v38  ;;  %v661_v46 = vpop.f32.mrf.mxu0  ;;  %vm934_vm4 = vcmp.ge.f32.partialorder %v925_v42, 0.0  ;;  %v943_v47 = vmul.f32 %v942_v44, %v925_v42  ;;  %v928_v59 = vadd.f32 %v1158_v36, %v913_v50 }
 0x107   : > { %v680_v54 = vadd.f32 %v661_v46, %v547_v48  ;;  %v953_v7 = vsel %vm936_vm6, %v927_v49, %v945_v62 }
 0x108   : > { %v926_v51 = vadd.f32 %v1158_v36, %v911_v45  ;;  %v951_v52 = vsel %vm934_vm4, %v925_v42, %v943_v47  ;;  %v1212_v53 = vpop.f32.mrf.mxu0  ;;  %v946_v8 = vmul.f32 %v942_v44, %v928_v59  ;;  %vm937_vm7 = vcmp.ge.f32.partialorder %v928_v59, 0.0 }
 0x109   : > { %959 = vxpose.xlu0.b32.start [1/8] (short) (narrow) %v951_v52, 8  ;;  %v1221_v55 = vpop.f32.mrf.mxu1  ;;  %v683_v11 = vadd.f32 %v1212_v53, %v558_v9 }
 0x10a   : > { %v664_v56 = vpop.f32.mrf.mxu0  ;;  %vm935_vm5 = vcmp.ge.f32.partialorder %v926_v51, 0.0  ;;  %v944_v57 = vmul.f32 %v942_v44, %v926_v51  ;;  %v916_v12 = vadd.f32 %v1221_v55, %v682_v4  ;;  %v954_v14 = vsel %vm937_vm7, %v928_v59, %v946_v8 }
 0x10b   : > { %v895_v60 = vpop.f32.mrf.mxu1  ;;  %v681_v0 = vadd.f32 %v664_v56, %v550_v58 }
 0x10c   : > { %v952_v61 = vsel %vm935_vm5, %v926_v51, %v944_v57  ;;  %v914_v63 = vadd.f32 %v895_v60, %v680_v54  ;;  %v931_v17 = vadd.f32 %v1158_v36, %v916_v12 }
 0x10d   : > { %960 = vxpose.xlu0.b32.cont [2/8] (short) (narrow) %v952_v61, 8  ;;  %v1222_v3 = vpop.f32.mrf.mxu1 }
 0x10e   : > { %v929_v5 = vadd.f32 %v1158_v36, %v914_v63  ;;  %v917_v19 = vadd.f32 %v1222_v3, %v683_v11  ;;  %v949_v21 = vmul.f32 %v942_v44, %v931_v17  ;;  %vm940_vm10 = vcmp.ge.f32.partialorder %v931_v17, 0.0 }
 0x10f   : > { %v898_v6 = vpop.f32.mrf.mxu1 }
 0x110   : > { %v915_v10 = vadd.f32 %v898_v6, %v681_v0  ;;  %v947_v16 = vmul.f32 %v942_v44, %v929_v5  ;;  %vm938_vm8 = vcmp.ge.f32.partialorder %v929_v5, 0.0  ;;  %v932_v22 = vadd.f32 %v1158_v36, %v917_v19 }
 0x111   : > { %961 = vxpose.xlu0.b32.cont [3/8] (short) (narrow) %v953_v7, 8  ;;  %v957_v33 = vsel %vm940_vm10, %v931_v17, %v949_v21 }
 0x112   : > { %v930_v13 = vadd.f32 %v1158_v36, %v915_v10  ;;  %v955_v15 = vsel %vm938_vm8, %v929_v5, %v947_v16  ;;  %v950_v23 = vmul.f32 %v942_v44, %v932_v22  ;;  %vm941_vm11 = vcmp.ge.f32.partialorder %v932_v22, 0.0 }
 0x114   : > { %v948_v18 = vmul.f32 %v942_v44, %v930_v13  ;;  %vm939_vm9 = vcmp.ge.f32.partialorder %v930_v13, 0.0  ;;  %v958_v24 = vsel %vm941_vm11, %v932_v22, %v950_v23 }
 0x115   : > { %962 = vxpose.xlu0.b32.cont [4/8] (short) (narrow) %v954_v14, 8 }
 0x116   : > { %v956_v20 = vsel %vm939_vm9, %v930_v13, %v948_v18 }
 0x119   : > { %963 = vxpose.xlu0.b32.cont [5/8] (short) (narrow) %v955_v15, 8 }
 0x11d   : > { %964 = vxpose.xlu0.b32.cont [6/8] (short) (narrow) %v956_v20, 8 }
 0x121   : > { %965 = vxpose.xlu0.b32.cont [7/8] (short) (narrow) %v957_v33, 8 }
 0x125   : > { %966 = vxpose.xlu0.b32.end [8/8] (short) (narrow) %v958_v24, 8 }
 0x185   : > { %v975_v25 = vpop.trf.xlu0 }
 0x186   : > { %992 = vst.msk [vmem:[%s215_s6] sm:$0xff] %vm991_vm12, %v975_v25 }
 0x187   : > { %1305 = shalt.err (!%p1302_p5)
}
 0x188   : > { %s1306_s15 = scalar_lea.hbm %s1575_s10, 128  ;;  %s1310_s23 = scalar_lea.hbm %s1619_s4, 256 }
 0x189   : > { %p1307_p6 = scmp.ne.s32.totalorder %s1575_s10, %s1306_s15  ;;  %p1311_p10 = scmp.lt.s32.totalorder %s1575_s10, %s1619_s4 }
 0x18a   : > { %p1312_p11 = scmp.lt.s32.totalorder %s1310_s23, %s1306_s15 }
 0x18b   : > { %p1308_p7 = pnand %p1307_p6, %p1439_p4 }
 0x18c   : > { %p1313_p12 = por %p1312_p11, %p1311_p10 }
 0x18d   : > { %p1309_p9 = pneg %p1308_p7 }
 0x18f   : > { %p1314_p13 = pnand %p1313_p12, %p1309_p9 }
 0x191   : > { %1317 = shalt.err (!%p1314_p13)
}
 0x192   : > { %1224 = dma.vmem_to_hbm [thread:$0]  (%p1439_p4), %s1009_s7, 128, %s1575_s10, %s994_s11  }
 0x193 PF: > { %p1230_p0 = scmp.ge.s32.totalorder %s1368_s22, 2  ;;  %s1020_s30 = sand.u32 1, %s1348_s17  }
 0x194   : > { %s1021_s5 = scalar_lea.sflag [#allocation4], %s1020_s30 }
 0x195   : > { %p1227_p1 = pnand %p1230_p0, %p1446_p8 }
 0x197   : > { %p1228_p2 = pneg %p1227_p1 }
 0x199   : > { %1343 = dma.done.wait (%p1228_p2), %s1021_s5, 128  }
 0x19a   : > { %1345 = vsyncadd (%p1228_p2), %s1021_s5, 4294967168  ;;  %s18_s22 = sadd.s32 1, %s1368_s22   ;;  %s1624_s17 = smov %s1352_s18 }
 0x19b   : > { %p15_p3 = scmp.ge.s32.totalorder %s18_s22, 4   ;;  %s1625_s18 = smov %s1356_s19 }
 0x19c   : > { %s1626_s19 = smov %s1452_s29  ;;  %s1627_s20 = smov %s1364_s21 }
 0x19d   : > { %s1628_s21 = smov %s1630_s24  ;;  %17 = sbr.rel (!%p15_p3) target bundleno = 6 (0x6), region = 75 }
 0x1a2   :  { %1026 = vsyncpa [#allocation4], 1 }
 0x1a3   :  { %1028 = vsyncpa [#allocation4 + $0x1], 1 }

</bundles_post_ra>
